<compile_context>
chip_gen: v7x
topology: tpu7x:2x2x1
jax: 0.10.0
libtpu: 0.0.40
codegen_flags: <defaults>
</compile_context>

<pallas_src>
import jax
import jax.numpy as jnp
from jax.experimental import pallas as pl
from jax.experimental.pallas import tpu as pltpu


def _copy_kernel(x_ref, o_ref):
    # Straight elementwise copy of the current (tile_rows, lanes) block.
    o_ref[...] = x_ref[...]


def _slab_shape(total):
    """Pick a sublane/lane-dense 2D shape (rows, lanes) with rows*lanes == total."""
    # Prefer rows % 8 == 0 and lanes % 128 == 0 (full vreg occupancy).
    for lanes in (2048, 1024, 512, 256, 128):
        if total % lanes == 0 and (total // lanes) % 8 == 0:
            return total // lanes, lanes
    # Next best: lane-dense only.
    for lanes in (2048, 1024, 512, 256, 128):
        if total % lanes == 0:
            return total // lanes, lanes
    return None


def identity_flatten(x):
    """Reproduces Identity.forward: returns x viewed as (m, -1)."""
    m = x.shape[0]
    d = 1
    for s in x.shape[1:]:
        d *= s

    x2 = x.reshape(m, d)  # metadata-only reshape: the module's actual semantics
    total = m * d
    itemsize = jnp.dtype(x2.dtype).itemsize

    slab = _slab_shape(total)
    if slab is None:
        # Odd sizes: keep the natural (m, d) layout, single full-array block.
        rows, lanes = m, d
        tile_rows = rows
    else:
        rows, lanes = slab
        # Cap per-tile VMEM (~2 MiB): with double-buffered in + out blocks the
        # live VMEM is ~4x tile bytes, well inside v5e/v6e/v7x scoped limits.
        max_tile_bytes = 2 * 1024 * 1024
        bytes_per_row = lanes * itemsize
        tile_rows = max(8, (max_tile_bytes // bytes_per_row) // 8 * 8)
        tile_rows = min(tile_rows, rows)

    xs = x2.reshape(rows, lanes)  # metadata-only on a contiguous row-major array
    grid = (pl.cdiv(rows, tile_rows),)

    out = pl.pallas_call(
        _copy_kernel,
        out_shape=jax.ShapeDtypeStruct((rows, lanes), xs.dtype),
        grid_spec=pltpu.PrefetchScalarGridSpec(
            num_scalar_prefetch=0,
            grid=grid,
            in_specs=[pl.BlockSpec((tile_rows, lanes), lambda i: (i, 0))],
            out_specs=pl.BlockSpec((tile_rows, lanes), lambda i: (i, 0)),
        ),
        # Identity copy: let XLA reuse the input HBM buffer for the output.
        input_output_aliases={0: 0},
        cost_estimate=pl.CostEstimate(
            flops=0,
            transcendentals=0,
            bytes_accessed=2 * total * itemsize,
        ),
        compiler_params=pltpu.CompilerParams(
            dimension_semantics=("parallel",),  # no reduction axis; v7x: 2 TCs
            vmem_limit_bytes=32 * 1024 * 1024,
        ),
    )(xs)

    return out.reshape(m, d)  # metadata-only reshape back to (m, d)


if __name__ == "__main__":
    key = jax.random.PRNGKey(0)
    x = jax.random.normal(key, (2, 4, 16, 16), dtype=jnp.float32)  # NCHW

    # Reference computed up front (x.view(m, -1) semantics).
    ref = x.reshape(x.shape[0], -1)

    y = identity_flatten(x)
    jax.block_until_ready(y)

    assert y.shape == (2, 4 * 16 * 16), y.shape
    assert y.dtype == x.dtype
    assert jnp.array_equal(y, ref)

    print("KERNEL_OK")
</pallas_src>

<mosaic_0001>
module attributes {stable_mosaic.version = 11 : i64} {
  func.func @_copy_kernel(%arg0: i32, %arg1: memref<8x256xf32, #tpu.memory_space<vmem>>, %arg2: memref<8x256xf32, #tpu.memory_space<vmem>>) attributes {dimension_semantics = [#tpu.dimension_semantics<parallel>], iteration_bounds = array<i64: 1>, scalar_prefetch = 0 : i64, scratch_operands = 0 : i64, tpu.core_type = #tpu.core_type<tc>, window_params = [{transform_indices = @transform_0, window_bounds = array<i64: 8, 256>}, {transform_indices = @transform_1, window_bounds = array<i64: 8, 256>}]} {
    %c0 = arith.constant 0 : index
    %c0_0 = arith.constant 0 : index
    %0 = vector.load %arg1[%c0, %c0_0] : memref<8x256xf32, #tpu.memory_space<vmem>>, vector<8x256xf32>
    %c0_1 = arith.constant 0 : index
    %c0_2 = arith.constant 0 : index
    %1 = vector.load %arg2[%c0_1, %c0_2] : memref<8x256xf32, #tpu.memory_space<vmem>>, vector<8x256xf32>
    tpu.vector_store %arg2[%c0_1, %c0_2], %0 {strides = array<i32>} : memref<8x256xf32, #tpu.memory_space<vmem>>, vector<8x256xf32>,
    return
  }
  func.func @transform_0(%arg0: i32) -> (i32, i32) {
    %c0_i32 = arith.constant 0 : i32
    %c0_i32_0 = arith.constant 0 : i32
    return %arg0, %c0_i32 : i32, i32
  }
  func.func @transform_1(%arg0: i32) -> (i32, i32) {
    %c0_i32 = arith.constant 0 : i32
    %c0_i32_0 = arith.constant 0 : i32
    return %arg0, %c0_i32 : i32, i32
  }
}

</mosaic_0001>

<bundles_post_ra>
// kernel: tpu_custom_call.1
= control target key start
LH: loop header
LB: loop body
LE: loop exit
PB: predicated region body
PF: predicated region fallthrough
CT: control target
= control target key end

     0   :  { %6 = vsyncpa [#allocation3], 0  ;;  %s126_s0 = inlined_call_operand.hbm [shape: f32[8,256], index: 0, kind: input, shape index: {}, may-alias: {0,1}]   ;;  %s127_s1 = inlined_call_operand.hbm [shape: f32[8,256], index: 1, kind: output, shape index: {}, may-alias: {0,1}]  }
   0x1   :  { %7 = vsyncpa [#allocation4], 0  ;;  %s90_s6 = smov [#allocation2]   ;;  %s42_s10 = scalar_lea.hbm %s126_s0, 256 }
   0x2   :  { %s14_s7 = sshll.u32 %s90_s6, 4  ;;  %p43_p0 = scmp.ne.s32.totalorder %s126_s0, %s42_s10  ;;  %s15_s7 = int_to_ptr.vmem [resolvable:$true] %s14_s7 }
   0x3   :  { %p46_p1 = scmp.lt.u32.totalorder %s42_s10, %s126_s0 }
   0x5   :  { %p48_p2 = pnand %p46_p1, %p43_p0 }
   0x7   :  { %51 = shalt.err (!%p48_p2)
}
   0x8   :  { %s52_s15 = scalar_lea.vmem %s15_s7, 256  ;;  %p57_p4 = scmp.lt.s32.totalorder %s15_s7, %s15_s7 }
   0x9   :  { %p53_p3 = scmp.ne.s32.totalorder %s15_s7, %s52_s15  ;;  %p58_p5 = scmp.lt.s32.totalorder %s52_s15, %s52_s15 }
   0xb   :  { %p59_p6 = por %p58_p5, %p57_p4 }
   0xd   :  { %p60_p7 = pnand %p59_p6, %p53_p3 }
   0xf   :  { %63 = shalt.err (!%p60_p7)
}
  0x10   :  { %17 = dma.hbm_to_vmem [thread:$0]  %s126_s0, 256, %s15_s7, [#allocation3]  }
  0x11   :  { %86 = dma.done.wait [#allocation3], 256  }
  0x12   :  { %87 = vsyncadd [#allocation3], 4294967040  ;;  %s91_s18 = smov [#allocation5]   ;;  %v21_v0 = vld [vmem:[#allocation2] sm:$0xff]  ;;  %v22_v1 = vld [vmem:[#allocation2 + $0x8] sm:$0xff] }
  0x13   :  { %s31_s19 = sshll.u32 %s91_s18, 4  ;;  %23 = vst [vmem:[#allocation5] sm:$0xff] %v21_v0  ;;  %24 = vst [vmem:[#allocation5 + $0x8] sm:$0xff] %v22_v1  ;;  %s32_s19 = int_to_ptr.vmem [resolvable:$true] %s31_s19 }
  0x14   :  { %s64_s20 = scalar_lea.vmem %s32_s19, 256  ;;  %p69_p9 = scmp.lt.s32.totalorder %s32_s19, %s32_s19 }
  0x15   :  { %p65_p8 = scmp.ne.s32.totalorder %s32_s19, %s64_s20  ;;  %p70_p10 = scmp.lt.s32.totalorder %s64_s20, %s64_s20 }
  0x17   :  { %p71_p11 = por %p70_p10, %p69_p9 }
  0x19   :  { %p72_p12 = pnand %p71_p11, %p65_p8 }
  0x1b   :  { %75 = shalt.err (!%p72_p12)
}
  0x1c   :  { %s76_s0 = scalar_lea.hbm %s127_s1, 256 }
  0x1d   :  { %p77_p13 = scmp.ne.s32.totalorder %s127_s1, %s76_s0  ;;  %p80_p0 = scmp.lt.u32.totalorder %s76_s0, %s127_s1 }
  0x1f   :  { %p82_p1 = pnand %p80_p0, %p77_p13 }
  0x21   :  { %85 = shalt.err (!%p82_p1)
}
  0x22   :  { %34 = dma.vmem_to_hbm [thread:$0]  %s32_s19, 256, %s127_s1, [#allocation4]  }
  0x23   :  { %88 = dma.done.wait [#allocation4], 256  }
  0x24   :  { %89 = vsyncadd [#allocation4], 4294967040 }
  0x25   :  { %38 = vsyncpa [#allocation3], 1 }
  0x26   :  { %39 = vsyncpa [#allocation4], 1 }

</bundles_post_ra>
